<compile_context>
chip_gen: v7x
topology: tpu7x:2x2x1
jax: 0.10.0
libtpu: 0.0.40
codegen_flags: <defaults>
</compile_context>

<pallas_src>
import functools

import jax
import jax.numpy as jnp
from jax import lax
from jax.experimental import pallas as pl
from jax.experimental.pallas import tpu as pltpu


def _round_up(x, m):
    return (x + m - 1) // m * m


def _cdiv(a, b):
    return -(-a // b)


def _actor_kernel(const_noise, max_sigma, half,
                  state_ref, w1_ref, b1_ref, w2_ref, b2_ref,
                  whead_ref, bhead_ref, out_ref):
    # State arrives f32 at its natural feature width; cast to bf16 in-kernel.
    x = state_ref[...].astype(w1_ref.dtype)                        # [TB, IN] bf16

    # fc1 + ReLU (bf16 operands, f32 accumulate)
    h1 = jnp.dot(x, w1_ref[...], preferred_element_type=jnp.float32) + b1_ref[...]
    h1 = jnp.maximum(h1, 0.0).astype(w2_ref.dtype)

    # fc2 + ReLU
    h2 = jnp.dot(h1, w2_ref[...], preferred_element_type=jnp.float32) + b2_ref[...]
    h2 = jnp.maximum(h2, 0.0).astype(whead_ref.dtype)

    # Fused mu|sigma head: lanes [0, half) = mu, [half, 2*half) = sigma.
    head = (jnp.dot(h2, whead_ref[...], preferred_element_type=jnp.float32)
            + bhead_ref[...])
    lane = lax.broadcasted_iota(jnp.int32, head.shape, 1)
    out = jnp.where(lane >= half, jnp.clip(head, const_noise, max_sigma), head)
    out_ref[...] = out.astype(out_ref.dtype)


def prepare_actor_params(params, *, compute_dtype=jnp.bfloat16):
    """One-time host-side prep: pad hidden dims to 128 lanes, pack the mu and
    sigma heads into one lane-dense slab, cast weights to bf16 (biases f32)."""
    in_size, hidden = params["w1"].shape
    out_size = params["wmu"].shape[1]
    h_p = _round_up(hidden, 128)
    # Pack both heads into one 128-lane slab when they fit, else one 128-pad each.
    half = 64 if 2 * out_size <= 128 else _round_up(out_size, 128)

    def pad2(a, rows, cols):
        return jnp.pad(a, ((0, rows - a.shape[0]), (0, cols - a.shape[1])))

    # W1 is NOT padded on the contraction (input) dim: the state is passed at
    # its natural width and contracted directly (K = in_size).
    w1 = pad2(params["w1"], in_size, h_p).astype(compute_dtype)
    b1 = pad2(params["b1"], 1, h_p).astype(jnp.float32)
    w2 = pad2(params["w2"], h_p, h_p).astype(compute_dtype)
    b2 = pad2(params["b2"], 1, h_p).astype(jnp.float32)
    whead = jnp.concatenate(
        [pad2(params["wmu"], h_p, half), pad2(params["wsig"], h_p, half)], axis=1
    ).astype(compute_dtype)
    bhead = jnp.concatenate(
        [pad2(params["bmu"], 1, half), pad2(params["bsig"], 1, half)], axis=1
    ).astype(jnp.float32)

    return dict(w1=w1, b1=b1, w2=w2, b2=b2, whead=whead, bhead=bhead,
                out_size=out_size, half=half)


def _pick_batch_tile(B, batch_tile):
    """Choose a batch tile: <= batch_tile rows, multiple of 16, minimal
    over-padding, and >= 2 grid steps for moderate batches (v7x megacore)."""
    n_tiles = max(1, _cdiv(B, batch_tile))
    if n_tiles == 1 and B > 256:
        n_tiles = 2          # split across both TensorCores on v7x
    return _round_up(_cdiv(B, n_tiles), 16)


def actor_forward(state, prepared, *, const_noise=1e-6, max_sigma=2.0,
                  batch_tile=1024):
    """Actor forward pass as a single batch-tiled Pallas kernel.

    state:    [B, input_size] float32
    prepared: output of prepare_actor_params
    returns:  (mu [B, O], sigma [B, O]) float32
    """
    B, in_size = state.shape
    assert in_size == prepared["w1"].shape[0]
    h_p = prepared["w1"].shape[1]
    half = prepared["half"]
    head_w = 2 * half
    out_size = prepared["out_size"]

    tb = _pick_batch_tile(B, batch_tile)
    b_p = _round_up(B, tb)
    # Rows-only zero pad (cheap); no lane padding / dtype cast on the host.
    x = state if b_p == B else jnp.pad(state, ((0, b_p - B), (0, 0)))

    kernel = functools.partial(
        _actor_kernel, float(const_noise), float(max_sigma), half)

    def full(shape):
        # Whole-array block, same block index every grid step -> VMEM-resident.
        return pl.BlockSpec(shape, lambda i, _n=len(shape): (0,) * _n)

    out = pl.pallas_call(
        kernel,
        out_shape=jax.ShapeDtypeStruct((b_p, head_w), jnp.float32),
        grid_spec=pltpu.PrefetchScalarGridSpec(
            num_scalar_prefetch=0,
            grid=(b_p // tb,),
            in_specs=[
                pl.BlockSpec((tb, in_size), lambda i: (i, 0)),   # state tiles (f32)
                full((in_size, h_p)), full((1, h_p)),            # w1, b1
                full((h_p, h_p)), full((1, h_p)),                # w2, b2
                full((h_p, head_w)), full((1, head_w)),          # fused mu|sigma head
            ],
            out_specs=pl.BlockSpec((tb, head_w), lambda i: (i, 0)),
        ),
        compiler_params=pltpu.CompilerParams(
            dimension_semantics=("parallel",)),                  # megacore on v7x
    )(x, prepared["w1"], prepared["b1"], prepared["w2"], prepared["b2"],
      prepared["whead"], prepared["bhead"])

    mu = out[:B, :out_size]
    sigma = out[:B, half:half + out_size]
    return mu, sigma


def init_actor_params(key, input_size, output_size, hidden_size):
    """Deterministic synthetic init (matches nn.Linear shapes, stored as [in, out])."""
    ks = jax.random.split(key, 8)

    def linear(kw, kb, fan_in, fan_out):
        bound = 1.0 / jnp.sqrt(fan_in)
        w = jax.random.uniform(kw, (fan_in, fan_out), jnp.float32, -bound, bound)
        b = jax.random.uniform(kb, (1, fan_out), jnp.float32, -bound, bound)
        return w, b

    w1, b1 = linear(ks[0], ks[1], input_size, hidden_size)
    w2, b2 = linear(ks[2], ks[3], hidden_size, hidden_size)
    wmu, bmu = linear(ks[4], ks[5], hidden_size, output_size)
    wsig, bsig = linear(ks[6], ks[7], hidden_size, output_size)
    return dict(w1=w1, b1=b1, w2=w2, b2=b2,
                wmu=wmu, bmu=bmu, wsig=wsig, bsig=bsig)


def actor_forward_ref(state, params, *, const_noise=1e-6, max_sigma=2.0):
    """Pure-JAX reference matching the kernel's bf16-operand / f32-accumulate numerics."""
    bf = jnp.bfloat16
    x = state.astype(bf)
    h1 = jnp.maximum(
        jnp.dot(x, params["w1"].astype(bf), preferred_element_type=jnp.float32)
        + params["b1"], 0.0).astype(bf)
    h2 = jnp.maximum(
        jnp.dot(h1, params["w2"].astype(bf), preferred_element_type=jnp.float32)
        + params["b2"], 0.0).astype(bf)
    mu = (jnp.dot(h2, params["wmu"].astype(bf), preferred_element_type=jnp.float32)
          + params["bmu"])
    sigma = jnp.clip(
        jnp.dot(h2, params["wsig"].astype(bf), preferred_element_type=jnp.float32)
        + params["bsig"], const_noise, max_sigma)
    return mu, sigma


if __name__ == "__main__":
    # Small shapes consistent with the module: state is [batch, input_size].
    B, INPUT, OUTPUT, HIDDEN = 8, 16, 4, 32
    MAX_ACTION = 1.0          # only used in .sample(), not in forward()
    CONST_NOISE = 1e-6
    MAX_SIGMA = 2.0

    key = jax.random.PRNGKey(0)
    k_state, k_params = jax.random.split(key)
    state = jax.random.normal(k_state, (B, INPUT), jnp.float32)
    params = init_actor_params(k_params, INPUT, OUTPUT, HIDDEN)
    prepared = prepare_actor_params(params)

    mu, sigma = actor_forward(state, prepared,
                              const_noise=CONST_NOISE, max_sigma=MAX_SIGMA)
    jax.block_until_ready((mu, sigma))

    mu_ref, sigma_ref = actor_forward_ref(state, params,
                                          const_noise=CONST_NOISE,
                                          max_sigma=MAX_SIGMA)
    assert mu.shape == (B, OUTPUT) and sigma.shape == (B, OUTPUT)
    assert jnp.allclose(mu, mu_ref, atol=1e-2, rtol=1e-2), \
        f"mu mismatch: {jnp.max(jnp.abs(mu - mu_ref))}"
    assert jnp.allclose(sigma, sigma_ref, atol=1e-2, rtol=1e-2), \
        f"sigma mismatch: {jnp.max(jnp.abs(sigma - sigma_ref))}"
    assert bool(jnp.all(sigma >= CONST_NOISE)) and bool(jnp.all(sigma <= MAX_SIGMA))

    # TODO(synk): `sample()` (Normal rsample/tanh/log_prob) is stochastic RL glue
    # outside forward(); it could be added with pltpu.prng_* if needed.
    print("KERNEL_OK")
</pallas_src>

<mosaic_0001>
module attributes {stable_mosaic.version = 11 : i64} {
  func.func @_actor_kernel(%arg0: i32, %arg1: memref<16x16xf32, #tpu.memory_space<vmem>>, %arg2: memref<16x128xbf16, #tpu.memory_space<vmem>>, %arg3: memref<1x128xf32, #tpu.memory_space<vmem>>, %arg4: memref<128x128xbf16, #tpu.memory_space<vmem>>, %arg5: memref<1x128xf32, #tpu.memory_space<vmem>>, %arg6: memref<128x128xbf16, #tpu.memory_space<vmem>>, %arg7: memref<1x128xf32, #tpu.memory_space<vmem>>, %arg8: memref<16x128xf32, #tpu.memory_space<vmem>>) attributes {dimension_semantics = [#tpu.dimension_semantics<parallel>], iteration_bounds = array<i64: 1>, scalar_prefetch = 0 : i64, scratch_operands = 0 : i64, tpu.core_type = #tpu.core_type<tc>, window_params = [{transform_indices = @transform_0, window_bounds = array<i64: 16, 16>}, {pipeline_mode = #tpu.pipeline_mode<synchronous>, transform_indices = @transform_1, window_bounds = array<i64: 16, 128>}, {pipeline_mode = #tpu.pipeline_mode<synchronous>, transform_indices = @transform_2, window_bounds = array<i64: 1, 128>}, {pipeline_mode = #tpu.pipeline_mode<synchronous>, transform_indices = @transform_3, window_bounds = array<i64: 128, 128>}, {pipeline_mode = #tpu.pipeline_mode<synchronous>, transform_indices = @transform_4, window_bounds = array<i64: 1, 128>}, {pipeline_mode = #tpu.pipeline_mode<synchronous>, transform_indices = @transform_5, window_bounds = array<i64: 128, 128>}, {pipeline_mode = #tpu.pipeline_mode<synchronous>, transform_indices = @transform_6, window_bounds = array<i64: 1, 128>}, {transform_indices = @transform_7, window_bounds = array<i64: 16, 128>}]} {
    %c0 = arith.constant 0 : index
    %c0_0 = arith.constant 0 : index
    %0 = vector.load %arg1[%c0, %c0_0] : memref<16x16xf32, #tpu.memory_space<vmem>>, vector<16x16xf32>
    %1 = arith.truncf %0 : vector<16x16xf32> to vector<16x16xbf16>
    %c0_1 = arith.constant 0 : index
    %c0_2 = arith.constant 0 : index
    %2 = vector.load %arg2[%c0_1, %c0_2] : memref<16x128xbf16, #tpu.memory_space<vmem>>, vector<16x128xbf16>
    %cst = arith.constant dense<0.000000e+00> : vector<16x128xf32>
    %3 = tpu.matmul %1, %2, %cst {dimension_numbers = #tpu.dot_dimension_numbers<[1], [0], [0], [1], [0, 0, 1, 1], [], []>} : vector<16x16xbf16>, vector<16x128xbf16>, vector<16x128xf32> -> vector<16x128xf32>
    %c0_3 = arith.constant 0 : index
    %c0_4 = arith.constant 0 : index
    %4 = vector.load %arg3[%c0_3, %c0_4] : memref<1x128xf32, #tpu.memory_space<vmem>>, vector<1x128xf32>
    %5 = vector.broadcast %4 : vector<1x128xf32> to vector<16x128xf32>
    %6 = arith.addf %3, %5 : vector<16x128xf32>
    %cst_5 = arith.constant 0.000000e+00 : f32
    %7 = vector.broadcast %cst_5 : f32 to vector<16x128xf32>
    %8 = arith.maximumf %6, %7 : vector<16x128xf32>
    %9 = arith.truncf %8 : vector<16x128xf32> to vector<16x128xbf16>
    %c0_6 = arith.constant 0 : index
    %c0_7 = arith.constant 0 : index
    %10 = vector.load %arg4[%c0_6, %c0_7] : memref<128x128xbf16, #tpu.memory_space<vmem>>, vector<128x128xbf16>
    %cst_8 = arith.constant dense<0.000000e+00> : vector<16x128xf32>
    %11 = tpu.matmul %9, %10, %cst_8 {dimension_numbers = #tpu.dot_dimension_numbers<[1], [0], [0], [1], [0, 0, 1, 1], [], []>} : vector<16x128xbf16>, vector<128x128xbf16>, vector<16x128xf32> -> vector<16x128xf32>
    %c0_9 = arith.constant 0 : index
    %c0_10 = arith.constant 0 : index
    %12 = vector.load %arg5[%c0_9, %c0_10] : memref<1x128xf32, #tpu.memory_space<vmem>>, vector<1x128xf32>
    %13 = vector.broadcast %12 : vector<1x128xf32> to vector<16x128xf32>
    %14 = arith.addf %11, %13 : vector<16x128xf32>
    %cst_11 = arith.constant 0.000000e+00 : f32
    %15 = vector.broadcast %cst_11 : f32 to vector<16x128xf32>
    %16 = arith.maximumf %14, %15 : vector<16x128xf32>
    %17 = arith.truncf %16 : vector<16x128xf32> to vector<16x128xbf16>
    %c0_12 = arith.constant 0 : index
    %c0_13 = arith.constant 0 : index
    %18 = vector.load %arg6[%c0_12, %c0_13] : memref<128x128xbf16, #tpu.memory_space<vmem>>, vector<128x128xbf16>
    %cst_14 = arith.constant dense<0.000000e+00> : vector<16x128xf32>
    %19 = tpu.matmul %17, %18, %cst_14 {dimension_numbers = #tpu.dot_dimension_numbers<[1], [0], [0], [1], [0, 0, 1, 1], [], []>} : vector<16x128xbf16>, vector<128x128xbf16>, vector<16x128xf32> -> vector<16x128xf32>
    %c0_15 = arith.constant 0 : index
    %c0_16 = arith.constant 0 : index
    %20 = vector.load %arg7[%c0_15, %c0_16] : memref<1x128xf32, #tpu.memory_space<vmem>>, vector<1x128xf32>
    %21 = vector.broadcast %20 : vector<1x128xf32> to vector<16x128xf32>
    %22 = arith.addf %19, %21 : vector<16x128xf32>
    %23 = tpu.iota {dimensions = array<i32: 1>} : vector<16x128xi32>
    %c64_i32 = arith.constant 64 : i32
    %24 = vector.broadcast %c64_i32 : i32 to vector<16x128xi32>
    %25 = arith.cmpi sge, %23, %24 : vector<16x128xi32>
    %cst_17 = arith.constant 9.99999997E-7 : f32
    %cst_18 = arith.constant 2.000000e+00 : f32
    %26 = vector.broadcast %cst_17 : f32 to vector<16x128xf32>
    %27 = arith.maximumf %26, %22 : vector<16x128xf32>
    %28 = vector.broadcast %cst_18 : f32 to vector<16x128xf32>
    %29 = arith.minimumf %28, %27 : vector<16x128xf32>
    %30 = arith.select %25, %29, %22 : vector<16x128xi1>, vector<16x128xf32>
    %c0_19 = arith.constant 0 : index
    %c0_20 = arith.constant 0 : index
    %31 = vector.load %arg8[%c0_19, %c0_20] : memref<16x128xf32, #tpu.memory_space<vmem>>, vector<16x128xf32>
    tpu.vector_store %arg8[%c0_19, %c0_20], %30 {strides = array<i32>} : memref<16x128xf32, #tpu.memory_space<vmem>>, vector<16x128xf32>,
    return
  }
  func.func @transform_0(%arg0: i32) -> (i32, i32) {
    %c0_i32 = arith.constant 0 : i32
    %c0_i32_0 = arith.constant 0 : i32
    return %arg0, %c0_i32 : i32, i32
  }
  func.func @transform_1(%arg0: i32) -> (i32, i32) {
    %c0_i32 = arith.constant 0 : i32
    %c0_i32_0 = arith.constant 0 : i32
    %c0_i32_1 = arith.constant 0 : i32
    return %c0_i32, %c0_i32_0 : i32, i32
  }
  func.func @transform_2(%arg0: i32) -> (i32, i32) {
    %c0_i32 = arith.constant 0 : i32
    %c0_i32_0 = arith.constant 0 : i32
    %c0_i32_1 = arith.constant 0 : i32
    return %c0_i32, %c0_i32_0 : i32, i32
  }
  func.func @transform_3(%arg0: i32) -> (i32, i32) {
    %c0_i32 = arith.constant 0 : i32
    %c0_i32_0 = arith.constant 0 : i32
    %c0_i32_1 = arith.constant 0 : i32
    return %c0_i32, %c0_i32_0 : i32, i32
  }
  func.func @transform_4(%arg0: i32) -> (i32, i32) {
    %c0_i32 = arith.constant 0 : i32
    %c0_i32_0 = arith.constant 0 : i32
    %c0_i32_1 = arith.constant 0 : i32
    return %c0_i32, %c0_i32_0 : i32, i32
  }
  func.func @transform_5(%arg0: i32) -> (i32, i32) {
    %c0_i32 = arith.constant 0 : i32
    %c0_i32_0 = arith.constant 0 : i32
    %c0_i32_1 = arith.constant 0 : i32
    return %c0_i32, %c0_i32_0 : i32, i32
  }
  func.func @transform_6(%arg0: i32) -> (i32, i32) {
    %c0_i32 = arith.constant 0 : i32
    %c0_i32_0 = arith.constant 0 : i32
    %c0_i32_1 = arith.constant 0 : i32
    return %c0_i32, %c0_i32_0 : i32, i32
  }
  func.func @transform_7(%arg0: i32) -> (i32, i32) {
    %c0_i32 = arith.constant 0 : i32
    %c0_i32_0 = arith.constant 0 : i32
    return %arg0, %c0_i32 : i32, i32
  }
}

</mosaic_0001>

<bundles_post_ra>
// kernel: tpu_custom_call.1
= control target key start
LH: loop header
LB: loop body
LE: loop exit
PB: predicated region body
PF: predicated region fallthrough
CT: control target
= control target key end

     0   :  { %12 = vsyncpa [#allocation3], 0  ;;  %s804_s0 = inlined_call_operand.hbm [shape: f32[16,16], index: 0, kind: input, shape index: {}]   ;;  %s805_s1 = inlined_call_operand.hbm [shape: bf16[16,128], index: 1, kind: input, shape index: {}]   ;;  %s806_s2 = inlined_call_operand.vmem [shape: f32[1,128], index: 2, kind: input, shape index: {}]   ;;  %s807_s3 = inlined_call_operand.hbm [shape: bf16[128,128], index: 3, kind: input, shape index: {}]   ;;  %s808_s4 = inlined_call_operand.vmem [shape: f32[1,128], index: 4, kind: input, shape index: {}]   ;;  %s809_s5 = inlined_call_operand.hbm [shape: bf16[128,128], index: 5, kind: input, shape index: {}]   ;;  %s810_s6 = inlined_call_operand.vmem [shape: f32[1,128], index: 6, kind: input, shape index: {}]   ;;  %s811_s7 = inlined_call_operand.hbm [shape: f32[16,128], index: 7, kind: output, shape index: {}]  }
   0x1   :  { %13 = vsyncpa [#allocation6], 0 }
   0x2   :  { %14 = vsyncpa [#allocation9], 0 }
   0x3   :  { %15 = vsyncpa [#allocation4], 0  ;;  %s639_s24 = smov [#allocation5]   ;;  %s521_s28 = scalar_lea.hbm %s805_s1, 128 }
   0x4   :  { %s33_s25 = sshll.u32 %s639_s24, 4  ;;  %p522_p0 = scmp.ne.s32.totalorder %s805_s1, %s521_s28  ;;  %s34_s25 = int_to_ptr.vmem [resolvable:$true] %s33_s25 }
   0x5   :  { %p525_p1 = scmp.lt.u32.totalorder %s521_s28, %s805_s1 }
   0x7   :  { %p527_p2 = pnand %p525_p1, %p522_p0 }
   0x9   :  { %530 = shalt.err (!%p527_p2)
}
   0xa   :  { %s531_s10 = scalar_lea.vmem %s34_s25, 128  ;;  %p536_p4 = scmp.lt.s32.totalorder %s34_s25, %s34_s25 }
   0xb   :  { %p532_p3 = scmp.ne.s32.totalorder %s34_s25, %s531_s10  ;;  %p537_p5 = scmp.lt.s32.totalorder %s531_s10, %s531_s10 }
   0xd   :  { %p538_p6 = por %p537_p5, %p536_p4 }
   0xf   :  { %p539_p7 = pnand %p538_p6, %p532_p3 }
  0x11   :  { %542 = shalt.err (!%p539_p7)
}
  0x12   :  { %s640_s11 = smov 64   ;;  %s641_s12 = smov 4  }
  0x13   :  { %39 = dma.hbm_to_vmem [thread:$0]  %s805_s1, 128, %s34_s25, [#allocation6], %s640_s11, %s640_s11, %s641_s12  }
  0x14   :  { %s642_s15 = smov [#allocation2]   ;;  %s543_s19 = scalar_lea.hbm %s804_s0, 256 }
  0x15   :  { %s21_s16 = sshll.u32 %s642_s15, 4  ;;  %p544_p8 = scmp.ne.s32.totalorder %s804_s0, %s543_s19  ;;  %s22_s16 = int_to_ptr.vmem [resolvable:$true] %s21_s16 }
  0x16   :  { %p547_p9 = scmp.lt.u32.totalorder %s543_s19, %s804_s0 }
  0x18   :  { %p549_p10 = pnand %p547_p9, %p544_p8 }
  0x1a   :  { %552 = shalt.err (!%p549_p10)
}
  0x1b   :  { %s553_s24 = scalar_lea.vmem %s22_s16, 256  ;;  %p558_p12 = scmp.lt.s32.totalorder %s22_s16, %s22_s16 }
  0x1c   :  { %p554_p11 = scmp.ne.s32.totalorder %s22_s16, %s553_s24  ;;  %p559_p13 = scmp.lt.s32.totalorder %s553_s24, %s553_s24 }
  0x1e   :  { %p560_p0 = por %p559_p13, %p558_p12 }
  0x20   :  { %p561_p1 = pnand %p560_p0, %p554_p11 }
  0x22   :  { %564 = shalt.err (!%p561_p1)
}
  0x23   :  { %s643_s1 = smov 128   ;;  %s644_s25 = smov 8  }
  0x24   :  { %27 = dma.hbm_to_vmem [thread:$0]  %s804_s0, 256, %s22_s16, [#allocation3], %s643_s1, %s643_s1, %s644_s25  }
  0x25   :  { %s645_s28 = smov [#allocation7]   ;;  %s646_s30 = smov [#allocation8]  }
  0x26   :  { %s47_s29 = sshll.u32 %s645_s28, 4  ;;  %s61_s8 = sshll.u32 %s646_s30, 4  ;;  %s48_s29 = int_to_ptr.vmem [resolvable:$true] %s47_s29  ;;  %s720_s8 = int_to_ptr.vmem [resolvable:$true] %s61_s8 }
  0x27   :  { %s565_s13 = scalar_lea.hbm %s807_s3, 1024 }
  0x28   :  { %p566_p2 = scmp.ne.s32.totalorder %s807_s3, %s565_s13  ;;  %p569_p3 = scmp.lt.u32.totalorder %s565_s13, %s807_s3 }
  0x2a   :  { %p571_p4 = pnand %p569_p3, %p566_p2 }
  0x2c   :  { %574 = shalt.err (!%p571_p4)
}
  0x2d   :  { %s575_s0 = scalar_lea.vmem %s48_s29, 1024  ;;  %p580_p6 = scmp.lt.s32.totalorder %s48_s29, %s48_s29 }
  0x2e   :  { %p576_p5 = scmp.ne.s32.totalorder %s48_s29, %s575_s0  ;;  %p581_p7 = scmp.lt.s32.totalorder %s575_s0, %s575_s0 }
  0x30   :  { %p582_p8 = por %p581_p7, %p580_p6 }
  0x32   :  { %p583_p9 = pnand %p582_p8, %p576_p5 }
  0x34   :  { %586 = shalt.err (!%p583_p9)
}
  0x35   :  { %53 = dma.hbm_to_vmem [thread:$0]  %s807_s3, 1024, %s48_s29, [#allocation6], %s640_s11, %s640_s11, %s641_s12  }
  0x36   :  { %s587_s22 = scalar_lea.hbm %s809_s5, 1024 }
  0x37   :  { %p588_p10 = scmp.ne.s32.totalorder %s809_s5, %s587_s22  ;;  %p591_p11 = scmp.lt.u32.totalorder %s587_s22, %s809_s5 }
  0x39   :  { %p593_p12 = pnand %p591_p11, %p588_p10 }
  0x3b   :  { %596 = shalt.err (!%p593_p12)
}
  0x3c   :  { %s597_s28 = scalar_lea.vmem %s720_s8, 1024  ;;  %p602_p0 = scmp.lt.s32.totalorder %s720_s8, %s720_s8 }
  0x3d   :  { %p598_p13 = scmp.ne.s32.totalorder %s720_s8, %s597_s28  ;;  %p603_p1 = scmp.lt.s32.totalorder %s597_s28, %s597_s28 }
  0x3f   :  { %p604_p2 = por %p603_p1, %p602_p0 }
  0x41   :  { %p605_p3 = pnand %p604_p2, %p598_p13 }
  0x43   :  { %608 = shalt.err (!%p605_p3)
}
  0x44   :  { %67 = dma.hbm_to_vmem [thread:$0]  %s809_s5, 1024, %s720_s8, [#allocation9], %s640_s11, %s640_s11, %s641_s12  }
  0x45   :  { %631 = dma.done.wait [#allocation3], 256  }
  0x46   :  { %632 = vsyncadd [#allocation3], 4294967040 }
  0x47   :  { %633 = dma.done.wait [#allocation6], 1152  }
  0x48   :  { %634 = vsyncadd [#allocation6], 4294966144 }
  0x49   :  { %635 = dma.done.wait [#allocation9], 1024  }
  0x4a   :  { %636 = vsyncadd [#allocation9], 4294966272  ;;  %v647_v0 = vmov 0.0   ;;  %vm648_vm0 = vmmov 0   ;;  %v504_v1 = vld [vmem:[#allocation5] sm:$0xff]   ;;  %v83_v2 = vld [vmem:[#allocation2] sm:$0xff]  ;;  %v376_v41 = vlaneseq }
  0x4b   :  { %447 = vmatprep.subr.bf16.mxu0 %v647_v0  ;;  %449 = vmatprep.mubr.msk.bf16.mxu0 %vm648_vm0, %v647_v0  ;;  %v84_v3 = vld [vmem:[#allocation2 + $0x8] sm:$0xff]  ;;  %vm101_vm1 = vcmask 130048   ;;  %v505_v5 = vld [vmem:[#allocation7] sm:$0xff]   ;;  %v506_v6 = vld [vmem:[#allocation7 + $0x8] sm:$0xff]  }
  0x4c   :  { %453 = vmatprep.subr.bf16.mxu1 %v647_v0  ;;  %469 = vmatprep.mubr.msk.bf16.mxu1 %vm648_vm0, %v647_v0  ;;  %v85_v4 = vpack.c.bf16 %v84_v3, %v83_v2  ;;  %v507_v7 = vld [vmem:[#allocation7 + $0x10] sm:$0xff]   ;;  %v508_v8 = vld [vmem:[#allocation7 + $0x18] sm:$0xff]   ;;  %v509_v9 = vld [vmem:[#allocation7 + $0x20] sm:$0xff]   ;;  %v377_v44 = vand.u32 127, %v376_v41 }
  0x4d   :  { %448 = vmatpush3.bf16.msra.mxu0 %v504_v1  ;;  %454 = vmatpush3.bf16.msra.mxu1 %v505_v5  ;;  %v510_v10 = vld [vmem:[#allocation7 + $0x28] sm:$0xff]   ;;  %v511_v11 = vld [vmem:[#allocation7 + $0x30] sm:$0xff]   ;;  %v512_v12 = vld [vmem:[#allocation7 + $0x38] sm:$0xff]  }
  0x4e   :  { %473 = vmatprep.subr.bf16.mxu0 %v647_v0  ;;  %455 = vmatprep.subr.bf16.mxu1 %v647_v0  ;;  %v513_v13 = vld [vmem:[#allocation8] sm:$0xff]   ;;  %v514_v14 = vld [vmem:[#allocation8 + $0x8] sm:$0xff]   ;;  %v515_v15 = vld [vmem:[#allocation8 + $0x10] sm:$0xff]   ;;  %vm378_vm2 = vcmp.ge.s32.totalorder %v377_v44, 64 }
  0x4f   :  { %v516_v16 = vld [vmem:[#allocation8 + $0x18] sm:$0xff]   ;;  %v517_v17 = vld [vmem:[#allocation8 + $0x20] sm:$0xff]   ;;  %v518_v18 = vld [vmem:[#allocation8 + $0x28] sm:$0xff]  }
  0x50   :  { %450 = vmatmul.mubr.msk.bf16.vlgmr.msra.gmra.mrb[0].mxu0 %vm101_vm1, %v85_v4  ;;  %v406_v19 = vld [vmem:[%s806_s2] ss:$0 sm:$0xff]  ;;  %v519_v29 = vld [vmem:[#allocation8 + $0x30] sm:$0xff]   ;;  %v520_v30 = vld [vmem:[#allocation8 + $0x38] sm:$0xff]  }
  0x51   :  { %489 = vmatprep.mubr.msk.bf16.mxu0 %vm648_vm0, %v647_v0  ;;  %456 = vmatpush3.bf16.msra.mxu1 %v506_v6  ;;  %v409_v31 = vld [vmem:[%s808_s4] ss:$0 sm:$0xff]  ;;  %s649_s4 = smov [#allocation10]  }
  0x52   :  { %457 = vmatprep.subr.bf16.mxu1 %v647_v0  ;;  %474 = vmatpush3.bf16.msra.mxu0 %v513_v13  ;;  %v418_v42 = vld [vmem:[%s810_s6] ss:$0 sm:$0xff]  ;;  %s392_s9 = sshll.u32 %s649_s4, 4  ;;  %s393_s9 = int_to_ptr.vmem [resolvable:$true] %s392_s9 }
  0x53   :  { %475 = vmatprep.subr.bf16.mxu0 %v647_v0  ;;  %s609_s6 = scalar_lea.vmem %s393_s9, 256  ;;  %p614_p5 = scmp.lt.s32.totalorder %s393_s9, %s393_s9 }
  0x54   :  { %p610_p4 = scmp.ne.s32.totalorder %s393_s9, %s609_s6  ;;  %p615_p6 = scmp.lt.s32.totalorder %s609_s6, %s609_s6 }
  0x55   :  { %458 = vmatpush3.bf16.msra.mxu1 %v507_v7 }
  0x56   :  { %459 = vmatprep.subr.bf16.mxu1 %v647_v0  ;;  %476 = vmatpush3.bf16.msra.mxu0 %v514_v14  ;;  %p616_p7 = por %p615_p6, %p614_p5 }
  0x57   :  { %477 = vmatprep.subr.bf16.mxu0 %v647_v0 }
  0x58   :  { %p617_p8 = pnand %p616_p7, %p610_p4 }
  0x59   :  { %460 = vmatpush3.bf16.msra.mxu1 %v508_v8 }
  0x5a   :  { %461 = vmatprep.subr.bf16.mxu1 %v647_v0  ;;  %478 = vmatpush3.bf16.msra.mxu0 %v515_v15 }
  0x5b   :  { %479 = vmatprep.subr.bf16.mxu0 %v647_v0 }
  0x5d   :  { %462 = vmatpush3.bf16.msra.mxu1 %v509_v9 }
  0x5e   :  { %463 = vmatprep.subr.bf16.mxu1 %v647_v0  ;;  %480 = vmatpush3.bf16.msra.mxu0 %v516_v16 }
  0x5f   :  { %481 = vmatprep.subr.bf16.mxu0 %v647_v0 }
  0x61   :  { %464 = vmatpush3.bf16.msra.mxu1 %v510_v10 }
  0x62   :  { %465 = vmatprep.subr.bf16.mxu1 %v647_v0  ;;  %482 = vmatpush3.bf16.msra.mxu0 %v517_v17 }
  0x63   :  { %483 = vmatprep.subr.bf16.mxu0 %v647_v0 }
  0x65   :  { %466 = vmatpush3.bf16.msra.mxu1 %v511_v11 }
  0x66   :  { %467 = vmatprep.subr.bf16.mxu1 %v647_v0  ;;  %484 = vmatpush3.bf16.msra.mxu0 %v518_v18 }
  0x67   :  { %485 = vmatprep.subr.bf16.mxu0 %v647_v0 }
  0x69   :  { %468 = vmatpush3.bf16.msra.mxu1 %v512_v12 }
  0x6a   :  { %486 = vmatpush3.bf16.msra.mxu0 %v519_v29 }
  0x6b   :  { %487 = vmatprep.subr.bf16.mxu0 %v647_v0 }
  0x6e   :  { %488 = vmatpush3.bf16.msra.mxu0 %v520_v30 }
 0x123   :  { %v139_v20 = vpop.f32.mrb[0].mxu0 }
 0x124   :  { %v140_v21 = vadd.f32 %v406_v19, %v139_v20  ;;  %v451_v22 = vpop.f32.mrb[1].mxu0 }
 0x125   :  { %v142_v23 = vpop.f32.mrb[2].mxu0 }
 0x126   :  { %v143_v24 = vadd.f32 %v406_v19, %v142_v23  ;;  %v452_v25 = vpop.f32.mrb[3].mxu0  ;;  %v146_v26 = vmax.f32 %v140_v21, 0.0 }
 0x128   :  { %v147_v27 = vmax.f32 %v143_v24, 0.0 }
 0x12a   :  { %v148_v28 = vpack.c.bf16 %v147_v27, %v146_v26 }
 0x12c   :  { %470 = vmatmul.mubr.bf16.vlgmr.msra.gmra.mrb[0].mxu1 %v148_v28 }
 0x1ff   :  { %v254_v32 = vpop.f32.mrb[0].mxu1 }
 0x200   :  { %v255_v33 = vadd.f32 %v409_v31, %v254_v32  ;;  %v471_v34 = vpop.f32.mrb[1].mxu1 }
 0x201   :  { %v257_v35 = vpop.f32.mrb[2].mxu1 }
 0x202   :  { %v258_v36 = vadd.f32 %v409_v31, %v257_v35  ;;  %v472_v37 = vpop.f32.mrb[3].mxu1  ;;  %v261_v38 = vmax.f32 %v255_v33, 0.0 }
 0x204   :  { %v262_v39 = vmax.f32 %v258_v36, 0.0 }
 0x206   :  { %v263_v40 = vpack.c.bf16 %v262_v39, %v261_v38 }
 0x208   :  { %490 = vmatmul.mubr.bf16.vlgmr.msra.gmra.mrb[4].mxu0 %v263_v40 }
 0x2db   :  { %v369_v43 = vpop.f32.mrb[4].mxu0 }
 0x2dc   :  { %v370_v45 = vadd.f32 %v418_v42, %v369_v43  ;;  %v491_v46 = vpop.f32.mrb[5].mxu0 }
 0x2dd   :  { %v372_v47 = vpop.f32.mrb[6].mxu0 }
 0x2de   :  { %v379_v48 = vmax.f32 %v370_v45, 1e-06  ;;  %v373_v49 = vadd.f32 %v418_v42, %v372_v47  ;;  %v492_v50 = vpop.f32.mrb[7].mxu0 }
 0x2e0   :  { %v381_v51 = vmin.f32 %v379_v48, 2.0  ;;  %v380_v52 = vmax.f32 %v373_v49, 1e-06 }
 0x2e2   :  { %v382_v53 = vmin.f32 %v380_v52, 2.0  ;;  %v383_v54 = vsel %vm378_vm2, %v381_v51, %v370_v45 }
 0x2e3   :  { %385 = vst [vmem:[#allocation10] sm:$0xff] %v383_v54 }
 0x2e4   :  { %v384_v55 = vsel %vm378_vm2, %v382_v53, %v373_v49 }
 0x2e5   :  { %386 = vst [vmem:[#allocation10 + $0x8] sm:$0xff] %v384_v55 }
 0x2e6   :  { %620 = shalt.err (!%p617_p8)
}
 0x2e7   :  { %s621_s14 = scalar_lea.hbm %s811_s7, 256 }
 0x2e8   :  { %p622_p9 = scmp.ne.s32.totalorder %s811_s7, %s621_s14  ;;  %p625_p10 = scmp.lt.u32.totalorder %s621_s14, %s811_s7 }
 0x2ea   :  { %p627_p11 = pnand %p625_p10, %p622_p9 }
 0x2ec   :  { %630 = shalt.err (!%p627_p11)
}
 0x2ed   :  { %398 = dma.vmem_to_hbm [thread:$0]  %s393_s9, 256, %s811_s7, [#allocation4], %s643_s1, %s643_s1, %s644_s25  }
 0x2ee   :  { %637 = dma.done.wait [#allocation4], 256  }
 0x2ef   :  { %638 = vsyncadd [#allocation4], 4294967040 }
 0x2f0   :  { %402 = vsyncpa [#allocation3], 1 }
 0x2f1   :  { %403 = vsyncpa [#allocation6], 1 }
 0x2f2   :  { %404 = vsyncpa [#allocation9], 1 }
 0x2f3   :  { %405 = vsyncpa [#allocation4], 1 }

</bundles_post_ra>
